<compile_context>
chip_gen: v7x
topology: tpu7x:2x2x1
jax: 0.10.0
libtpu: 0.0.40
codegen_flags: <defaults>
</compile_context>

<pallas_src>
import math

import jax
import jax.numpy as jnp
from jax.experimental import pallas as pl
from jax.experimental.pallas import tpu as pltpu  # noqa: F401  (kept for TPU-specific tuning hooks)


def ddpm_loss_kernel(x_ref, n_ref,            # VMEM: (C, N), (C, N)     N = B*HW
                     a_ref, s_ref,            # VMEM: (1, N), (1, N)     per-lane q_sample coefs
                     bias1_ref,               # VMEM: (Ch, N)            b1 + wt @ temb, per batch
                     w1_ref, w2_ref, b2_ref,  # VMEM: (Ch, C), (C, Ch), (C, 1)
                     out_ref):                # VMEM: (1, N)             per-lane SSE (lane-dense)
    x = x_ref[...]                 # (C, N)
    n = n_ref[...]                 # (C, N)

    # q_sample: forward diffusion  x_noisy = sqrt(acp[t]) * x + sqrt(1-acp[t]) * noise
    x_noisy = a_ref[...] * x + s_ref[...] * n            # (C, N)

    # stand-in UNet layer 1: 1x1 conv + (bias + projected time embedding).
    # K = C = 4 -> do it as C unrolled broadcast-FMAs on the VPU instead of a
    # degenerate MXU matmul; start from the pre-folded bias (saves a full-width add).
    w1 = w1_ref[...]                                      # (Ch, C)
    h = bias1_ref[...]                                    # (Ch, N)
    c_dim = x.shape[0]
    for c in range(c_dim):                                # static unroll (C = 4)
        h = h + w1[:, c:c + 1] * x_noisy[c:c + 1, :]

    # SiLU: exp and approx reciprocal both run on the EUP slot; only the
    # multiply hits the VPU.
    sig = pl.reciprocal(1.0 + jnp.exp(-h), approx=True)
    h = h * sig

    # stand-in UNet layer 2: 1x1 conv on the MXU (K = Ch = 32), f32 accumulation.
    pred = jnp.dot(w2_ref[...], h, preferred_element_type=jnp.float32) + b2_ref[...]   # (C, N)

    # per-lane SSE, reduced over channels (sublane reduce on the XLU).
    sq = (pred - n) ** 2
    out_ref[...] = jnp.sum(sq, axis=0, keepdims=True)     # (1, N) lane-dense store


def make_schedule(timesteps, beta_start=1e-4, beta_end=0.02):
    # linear beta schedule, matching DDPM.get_betas('linear')
    betas = jnp.linspace(beta_start, beta_end, timesteps, dtype=jnp.float32)
    alphas = 1.0 - betas
    alphas_cumprod = jnp.cumprod(alphas)
    return {
        "sqrt_alphas_cumprod": jnp.sqrt(alphas_cumprod),
        "sqrt_one_minus_alphas_cumprod": jnp.sqrt(1.0 - alphas_cumprod),
    }


def sinusoidal_time_embedding(t, dim):
    half = dim // 2
    freqs = jnp.exp(-math.log(10000.0) * jnp.arange(half, dtype=jnp.float32) / half)
    ang = t.astype(jnp.float32)[:, None] * freqs[None, :]
    return jnp.concatenate([jnp.sin(ang), jnp.cos(ang)], axis=-1)   # (B, dim)


def ddpm_forward_loss(x, noise, t, sched, params):
    """x, noise: (B, C, H, W) float32 NCHW; t: (B,) int32."""
    B, C, H, W = x.shape
    HW = H * W
    N = B * HW
    Ch, E = params["w1"].shape[0], params["wt"].shape[1]

    # coefficient gather (self._extract) — scalar glue kept in JAX, then
    # broadcast along the lane axis (lane l belongs to batch l // HW).
    coef_a = sched["sqrt_alphas_cumprod"][t].astype(jnp.float32)                 # (B,)
    coef_b = sched["sqrt_one_minus_alphas_cumprod"][t].astype(jnp.float32)       # (B,)
    a_lane = jnp.repeat(coef_a, HW).reshape(1, N)                                # (1, N)
    s_lane = jnp.repeat(coef_b, HW).reshape(1, N)                                # (1, N)

    # time-embedding projection hoisted out of the kernel and folded into b1
    # (2K-FLOP matvec, pure scalar glue for XLA).
    temb = sinusoidal_time_embedding(t, E)                                       # (B, E)
    tproj = temb @ params["wt"].T                                                # (B, Ch)
    bias1 = params["b1"] + tproj.T                                               # (Ch, B)
    bias1_lane = jnp.repeat(bias1, HW, axis=1)                                   # (Ch, N)

    # batch onto the lane axis: (B, C, HW) -> (C, B, HW) -> (C, B*HW)
    x2 = jnp.transpose(x.reshape(B, C, HW), (1, 0, 2)).reshape(C, N).astype(jnp.float32)
    n2 = jnp.transpose(noise.reshape(B, C, HW), (1, 0, 2)).reshape(C, N).astype(jnp.float32)

    # Single program, whole arrays resident in VMEM (~90 KiB total), no grid /
    # pipelining needed at these sizes.
    sse_lane = pl.pallas_call(
        ddpm_loss_kernel,
        out_shape=jax.ShapeDtypeStruct((1, N), jnp.float32),
    )(x2, n2, a_lane, s_lane, bias1_lane,
      params["w1"], params["w2"], params["b2"])

    # F.mse_loss is a mean over all elements
    return jnp.sum(sse_lane) / (B * C * HW)


def ref_loss(x, noise, t, sched, params):
    """Pure-JAX reference of the same forward pass (for verification)."""
    B, C, H, W = x.shape
    a = sched["sqrt_alphas_cumprod"][t][:, None, None, None]
    s = sched["sqrt_one_minus_alphas_cumprod"][t][:, None, None, None]
    x_noisy = (a * x + s * noise).reshape(B, C, -1)
    E = params["wt"].shape[1]
    temb = sinusoidal_time_embedding(t, E)                          # (B, E)
    tproj = temb @ params["wt"].T                                   # (B, Ch)
    h = (jnp.einsum("oc,bcl->bol", params["w1"], x_noisy)
         + params["b1"][None] + tproj[:, :, None])
    h = h * jax.nn.sigmoid(h)
    pred = jnp.einsum("co,bol->bcl", params["w2"], h) + params["b2"][None]
    return jnp.mean((pred - noise.reshape(B, C, -1)) ** 2)


if __name__ == "__main__":
    key = jax.random.PRNGKey(0)
    k_x, k_noise, k_t, k_w1, k_b1, k_wt, k_w2, k_b2 = jax.random.split(key, 8)

    B, C, H, W = 2, 4, 16, 16
    Ch, E, T = 32, 32, 50

    x = jax.random.normal(k_x, (B, C, H, W), dtype=jnp.float32)
    noise = jax.random.normal(k_noise, (B, C, H, W), dtype=jnp.float32)   # randn_like(x)
    t = jax.random.randint(k_t, (B,), 0, T)                               # randint(0, T, (B,))

    params = {
        "w1": jax.random.normal(k_w1, (Ch, C), jnp.float32) / math.sqrt(C),
        "b1": 0.1 * jax.random.normal(k_b1, (Ch, 1), jnp.float32),
        "wt": jax.random.normal(k_wt, (Ch, E), jnp.float32) / math.sqrt(E),
        "w2": jax.random.normal(k_w2, (C, Ch), jnp.float32) / math.sqrt(Ch),
        "b2": 0.1 * jax.random.normal(k_b2, (C, 1), jnp.float32),
    }
    sched = make_schedule(T)

    loss = ddpm_forward_loss(x, noise, t, sched, params)
    jax.block_until_ready(loss)

    ref = ref_loss(x, noise, t, sched, params)
    # slightly loose rtol: in-kernel sigmoid uses the EUP approx reciprocal
    assert jnp.allclose(loss, ref, rtol=5e-3, atol=1e-4), (loss, ref)

    print("KERNEL_OK")
</pallas_src>

<mosaic_0001>
module attributes {stable_mosaic.version = 11 : i64} {
  func.func @ddpm_loss_kernel(%arg0: memref<4x512xf32, #tpu.memory_space<vmem>>, %arg1: memref<4x512xf32, #tpu.memory_space<vmem>>, %arg2: memref<1x512xf32, #tpu.memory_space<vmem>>, %arg3: memref<1x512xf32, #tpu.memory_space<vmem>>, %arg4: memref<32x512xf32, #tpu.memory_space<vmem>>, %arg5: memref<32x4xf32, #tpu.memory_space<vmem>>, %arg6: memref<4x32xf32, #tpu.memory_space<vmem>>, %arg7: memref<4x1xf32, #tpu.memory_space<vmem>>, %arg8: memref<1x512xf32, #tpu.memory_space<vmem>>) attributes {dimension_semantics = [], scalar_prefetch = 0 : i64, scratch_operands = 0 : i64, tpu.core_type = #tpu.core_type<tc>} {
    %c0 = arith.constant 0 : index
    %c0_0 = arith.constant 0 : index
    %0 = vector.load %arg0[%c0, %c0_0] : memref<4x512xf32, #tpu.memory_space<vmem>>, vector<4x512xf32>
    %c0_1 = arith.constant 0 : index
    %c0_2 = arith.constant 0 : index
    %1 = vector.load %arg1[%c0_1, %c0_2] : memref<4x512xf32, #tpu.memory_space<vmem>>, vector<4x512xf32>
    %c0_3 = arith.constant 0 : index
    %c0_4 = arith.constant 0 : index
    %2 = vector.load %arg2[%c0_3, %c0_4] : memref<1x512xf32, #tpu.memory_space<vmem>>, vector<1x512xf32>
    %3 = vector.broadcast %2 : vector<1x512xf32> to vector<4x512xf32>
    %4 = arith.mulf %3, %0 : vector<4x512xf32>
    %c0_5 = arith.constant 0 : index
    %c0_6 = arith.constant 0 : index
    %5 = vector.load %arg3[%c0_5, %c0_6] : memref<1x512xf32, #tpu.memory_space<vmem>>, vector<1x512xf32>
    %6 = vector.broadcast %5 : vector<1x512xf32> to vector<4x512xf32>
    %7 = arith.mulf %6, %1 : vector<4x512xf32>
    %8 = arith.addf %4, %7 : vector<4x512xf32>
    %c0_7 = arith.constant 0 : index
    %c0_8 = arith.constant 0 : index
    %9 = vector.load %arg5[%c0_7, %c0_8] : memref<32x4xf32, #tpu.memory_space<vmem>>, vector<32x4xf32>
    %c0_9 = arith.constant 0 : index
    %c0_10 = arith.constant 0 : index
    %10 = vector.load %arg4[%c0_9, %c0_10] : memref<32x512xf32, #tpu.memory_space<vmem>>, vector<32x512xf32>
    %11 = vector.extract_strided_slice %9 {offsets = [0, 0], sizes = [32, 1], strides = [1, 1]} : vector<32x4xf32> to vector<32x1xf32>
    %12 = vector.extract_strided_slice %8 {offsets = [0, 0], sizes = [1, 512], strides = [1, 1]} : vector<4x512xf32> to vector<1x512xf32>
    %13 = vector.broadcast %11 : vector<32x1xf32> to vector<32x512xf32>
    %14 = vector.broadcast %12 : vector<1x512xf32> to vector<32x512xf32>
    %15 = arith.mulf %13, %14 : vector<32x512xf32>
    %16 = arith.addf %10, %15 : vector<32x512xf32>
    %17 = vector.extract_strided_slice %9 {offsets = [0, 1], sizes = [32, 1], strides = [1, 1]} : vector<32x4xf32> to vector<32x1xf32>
    %18 = vector.extract_strided_slice %8 {offsets = [1, 0], sizes = [1, 512], strides = [1, 1]} : vector<4x512xf32> to vector<1x512xf32>
    %19 = vector.broadcast %17 : vector<32x1xf32> to vector<32x512xf32>
    %20 = vector.broadcast %18 : vector<1x512xf32> to vector<32x512xf32>
    %21 = arith.mulf %19, %20 : vector<32x512xf32>
    %22 = arith.addf %16, %21 : vector<32x512xf32>
    %23 = vector.extract_strided_slice %9 {offsets = [0, 2], sizes = [32, 1], strides = [1, 1]} : vector<32x4xf32> to vector<32x1xf32>
    %24 = vector.extract_strided_slice %8 {offsets = [2, 0], sizes = [1, 512], strides = [1, 1]} : vector<4x512xf32> to vector<1x512xf32>
    %25 = vector.broadcast %23 : vector<32x1xf32> to vector<32x512xf32>
    %26 = vector.broadcast %24 : vector<1x512xf32> to vector<32x512xf32>
    %27 = arith.mulf %25, %26 : vector<32x512xf32>
    %28 = arith.addf %22, %27 : vector<32x512xf32>
    %29 = vector.extract_strided_slice %9 {offsets = [0, 3], sizes = [32, 1], strides = [1, 1]} : vector<32x4xf32> to vector<32x1xf32>
    %30 = vector.extract_strided_slice %8 {offsets = [3, 0], sizes = [1, 512], strides = [1, 1]} : vector<4x512xf32> to vector<1x512xf32>
    %31 = vector.broadcast %29 : vector<32x1xf32> to vector<32x512xf32>
    %32 = vector.broadcast %30 : vector<1x512xf32> to vector<32x512xf32>
    %33 = arith.mulf %31, %32 : vector<32x512xf32>
    %34 = arith.addf %28, %33 : vector<32x512xf32>
    %cst = arith.constant 0.000000e+00 : f32
    %35 = vector.broadcast %cst : f32 to vector<32x512xf32>
    %36 = arith.subf %35, %34 : vector<32x512xf32>
    %37 = math.exp %36 : vector<32x512xf32>
    %cst_11 = arith.constant 1.000000e+00 : f32
    %38 = vector.broadcast %cst_11 : f32 to vector<32x512xf32>
    %39 = arith.addf %38, %37 : vector<32x512xf32>
    %40 = tpu.reciprocal %39 {approx = true} : vector<32x512xf32> -> vector<32x512xf32>
    %41 = arith.mulf %34, %40 : vector<32x512xf32>
    %c0_12 = arith.constant 0 : index
    %c0_13 = arith.constant 0 : index
    %42 = vector.load %arg6[%c0_12, %c0_13] : memref<4x32xf32, #tpu.memory_space<vmem>>, vector<4x32xf32>
    %cst_14 = arith.constant dense<0.000000e+00> : vector<4x512xf32>
    %43 = tpu.matmul %42, %41, %cst_14 {dimension_numbers = #tpu.dot_dimension_numbers<[1], [0], [0], [1], [0, 0, 1, 1], [], []>} : vector<4x32xf32>, vector<32x512xf32>, vector<4x512xf32> -> vector<4x512xf32>
    %c0_15 = arith.constant 0 : index
    %c0_16 = arith.constant 0 : index
    %44 = vector.load %arg7[%c0_15, %c0_16] : memref<4x1xf32, #tpu.memory_space<vmem>>, vector<4x1xf32>
    %45 = vector.broadcast %44 : vector<4x1xf32> to vector<4x512xf32>
    %46 = arith.addf %43, %45 : vector<4x512xf32>
    %47 = arith.subf %46, %1 : vector<4x512xf32>
    %48 = arith.mulf %47, %47 : vector<4x512xf32>
    %cst_17 = arith.constant dense<0.000000e+00> : vector<512xf32>
    %49 = vector.multi_reduction <add>, %48, %cst_17 [0] : vector<4x512xf32> to vector<512xf32>
    %50 = vector.shape_cast %49 : vector<512xf32> to vector<1x512xf32>
    %c0_18 = arith.constant 0 : index
    %c0_19 = arith.constant 0 : index
    %51 = vector.load %arg8[%c0_18, %c0_19] : memref<1x512xf32, #tpu.memory_space<vmem>>, vector<1x512xf32>
    tpu.vector_store %arg8[%c0_18, %c0_19], %50 {strides = array<i32>} : memref<1x512xf32, #tpu.memory_space<vmem>>, vector<1x512xf32>,
    return
  }
}

</mosaic_0001>

<bundles_post_ra>
// kernel: tpu_custom_call.1
= control target key start
LH: loop header
LB: loop body
LE: loop exit
PB: predicated region body
PF: predicated region fallthrough
CT: control target
= control target key end

     0   :  { %13 = vsyncpa [#allocation3], 0  ;;  %s1264_s0 = inlined_call_operand.vmem [shape: f32[4,512], index: 0, kind: input, shape index: {}]   ;;  %s1265_s1 = inlined_call_operand.vmem [shape: f32[4,512], index: 1, kind: input, shape index: {}]   ;;  %s1266_s2 = inlined_call_operand.vmem [shape: f32[1,512], index: 2, kind: input, shape index: {}]   ;;  %s1267_s3 = inlined_call_operand.vmem [shape: f32[1,512], index: 3, kind: input, shape index: {}]   ;;  %s1268_s4 = inlined_call_operand.hbm [shape: f32[32,512], index: 4, kind: input, shape index: {}]   ;;  %s1269_s5 = inlined_call_operand.vmem [shape: f32[32,4], index: 5, kind: input, shape index: {}]   ;;  %s1270_s6 = inlined_call_operand.vmem [shape: f32[4,32], index: 6, kind: input, shape index: {}]   ;;  %s1271_s7 = inlined_call_operand.vmem [shape: f32[4,1], index: 7, kind: input, shape index: {}]   ;;  %s1272_s8 = inlined_call_operand.hbm [shape: f32[1,512], index: 8, kind: output, shape index: {}]  }
   0x1   :  { %14 = vsyncpa [#allocation4], 0  ;;  %s888_s27 = smov [#allocation2]   ;;  %s840_s9 = scalar_lea.hbm %s1268_s4, 2048 }
   0x2   :  { %s28_s28 = sshll.u32 %s888_s27, 4  ;;  %p841_p0 = scmp.ne.s32.totalorder %s1268_s4, %s840_s9  ;;  %s29_s28 = int_to_ptr.vmem [resolvable:$true] %s28_s28 }
   0x3   :  { %p844_p1 = scmp.lt.u32.totalorder %s840_s9, %s1268_s4 }
   0x5   :  { %p846_p2 = pnand %p844_p1, %p841_p0 }
   0x7   :  { %849 = shalt.err (!%p846_p2)
}
   0x8   :  { %s850_s14 = scalar_lea.vmem %s29_s28, 2048  ;;  %p855_p4 = scmp.lt.s32.totalorder %s29_s28, %s29_s28 }
   0x9   :  { %p851_p3 = scmp.ne.s32.totalorder %s29_s28, %s850_s14  ;;  %p856_p5 = scmp.lt.s32.totalorder %s850_s14, %s850_s14 }
   0xb   :  { %p857_p6 = por %p856_p5, %p855_p4 }
   0xd   :  { %p858_p7 = pnand %p857_p6, %p851_p3 }
   0xf   :  { %861 = shalt.err (!%p858_p7)
}
  0x10   :  { %s889_s15 = smov 512   ;;  %s890_s16 = smov 32  }
  0x11   :  { %34 = dma.hbm_to_vmem [thread:$0]  %s1268_s4, 2048, %s29_s28, [#allocation3], %s889_s15, %s889_s15, %s890_s16  }
  0x12   :  { %884 = dma.done.wait [#allocation3], 2048  }
  0x13   :  { %885 = vsyncadd [#allocation3], 4294965248  ;;  %v891_v0 = vmov 1   ;;  %v892_v1 = vmov 0   ;;  %v116_v2 = vld [vmem:[%s1269_s5] sm:$0xff]  ;;  %v117_v3 = vld [vmem:[%s1269_s5 + $0x8] sm:$0xff]  ;;  %v1273_v10 = vlaneseq }
  0x14   :  { %760 = vset.pattern.permute.xlu1 %v891_v0  ;;  %759 = vset.pattern.permute.xlu0 %v892_v1  ;;  %v118_v4 = vld [vmem:[%s1269_s5 + $0x10] sm:$0xff]  ;;  %v119_v5 = vld [vmem:[%s1269_s5 + $0x18] sm:$0xff]  ;;  %v893_v6 = vmov 2   ;;  %v894_v7 = vmov 3   ;;  %v895_v8 = vmov 0.0   ;;  %v44_v15 = vld [vmem:[%s1264_s0] sm:$0xff] }
  0x15   :  { %205 = vperm.xlu1 %760, %v116_v2   ;;  %138 = vperm.xlu0 %759, %v116_v2   ;;  %v493_v9 = vld [vmem:[%s1271_s7] sm:$0xf]  ;;  %v971_v11 = vshrl.u32 %v1273_v10, 7  ;;  %v45_v16 = vld [vmem:[%s1264_s0 + $0x8] sm:$0xff]  ;;  %v72_v22 = vcombine.high %v44_v15, %v44_v15  ;;  %vm499_vm0 = vcmask 261120   ;;  %vm653_vm1 = vcmask 1043456  }
  0x16   :  { %567 = vmatprep.mubr.f32.mxu0 %v895_v8  ;;  %638 = vmatprep.mubr.f32.mxu1 %v895_v8  ;;  %v48_v17 = vld [vmem:[%s1266_s2] sm:$0xf]  ;;  %v998_v20 = vld [vmem:[%s1265_s1 + $0x8] sm:$0xff]  ;;  %v73_v23 = vcombine.high %v45_v16, %v45_v16  ;;  %s897_s2 = smov [#allocation5]  }
  0x17   :  { %1275 = vst [vmem:[#allocation8_spill] sm:$0xff] %v971_v11  ;;  %v52_v12 = vsub.s32 0, %v971_v11  ;;  %v56_v13 = vsub.s32 1, %v971_v11  ;;  %v976_v14 = vsub.s32 3, %v971_v11  ;;  %v80_v18 = vld [vmem:[%s1267_s3] sm:$0xf]  ;;  %v1009_v31 = vcombine.high %v998_v20, %v998_v20 }
  0x18   :  { %v993_v19 = vld [vmem:[%s1265_s1] sm:$0xff]  ;;  %v60_v21 = vsub.s32 2, %v971_v11  ;;  %s722_s3 = sshll.u32 %s897_s2, 4  ;;  %s723_s3 = int_to_ptr.vmem [resolvable:$true] %s722_s3 }
  0x19   :  { %209 = vperm.xlu1 %760, %v117_v3   ;;  %143 = vperm.xlu0 %759, %v117_v3   ;;  %v53_v24 = vrot.slane %v48_v17, %v52_v12  ;;  %v57_v25 = vrot.slane %v48_v17, %v56_v13  ;;  %v65_v26 = vrot.slane %v48_v17, %v976_v14  ;;  %p867_p9 = scmp.lt.s32.totalorder %s723_s3, %s723_s3 }
  0x1a   :  { %v85_v27 = vrot.slane %v80_v18, %v52_v12  ;;  %v89_v28 = vrot.slane %v80_v18, %v56_v13  ;;  %v97_v29 = vrot.slane %v80_v18, %v976_v14  ;;  %v1005_v30 = vcombine.high %v993_v19, %v993_v19 }
  0x1b   :  { %v61_v33 = vrot.slane %v48_v17, %v60_v21  ;;  %v93_v34 = vrot.slane %v80_v18, %v60_v21  ;;  %v76_v36 = vmul.f32 %v53_v24, %v44_v15  ;;  %v77_v37 = vmul.f32 %v72_v22, %v57_v25 }
  0x1c   :  { %v79_v38 = vmul.f32 %v73_v23, %v65_v26  ;;  %v108_v39 = vmul.f32 %v85_v27, %v993_v19  ;;  %v109_v40 = vmul.f32 %v1005_v30, %v89_v28  ;;  %v111_v41 = vmul.f32 %v1009_v31, %v97_v29 }
  0x1d   :  { %761 = vset.pattern.permute.xlu1 %v892_v1  ;;  %148 = vperm.xlu0 %759, %v118_v4   ;;  %v78_v42 = vmul.f32 %v61_v33, %v45_v16  ;;  %v110_v43 = vmul.f32 %v93_v34, %v998_v20  ;;  %v125_v34 = vld [vmem:[#allocation2 + $0x28] sm:$0xff] }
  0x1e   :  { %153 = vperm.xlu1 %761, %v119_v5   ;;  %v112_v46 = vadd.f32 %v108_v39, %v76_v36  ;;  %v113_v47 = vadd.f32 %v109_v40, %v77_v37  ;;  %v115_v48 = vadd.f32 %v111_v41, %v79_v38  ;;  %v124_v39 = vld [vmem:[#allocation2 + $0x20] sm:$0xff]  ;;  %v126_v40 = vld [vmem:[#allocation2 + $0x30] sm:$0xff]  ;;  %v127_v41 = vld [vmem:[#allocation2 + $0x38] sm:$0xff] }
  0x1f   :  { %v114_v49 = vadd.f32 %v110_v43, %v78_v42 }
  0x20   :  { %v159_v52 = vrot.slane %v112_v46, %v52_v12  ;;  %v163_v53 = vrot.slane %v113_v47, %v52_v12  ;;  %v1017_v54 = vrot.slane %v115_v48, %v52_v12  ;;  %v1021_v56 = vrot.slane %v112_v46, %v56_v13 }
  0x21   :  { %764 = vset.pattern.permute.xlu0 %v891_v0  ;;  %v1019_v55 = vrot.slane %v114_v49, %v52_v12  ;;  %v1026_v61 = vrot.slane %v113_v47, %v56_v13  ;;  %v1028_v62 = vrot.slane %v114_v49, %v56_v13  ;;  %v1030_v63 = vrot.slane %v115_v48, %v56_v13 }
  0x22   :  { %762 = vset.pattern.permute.xlu1 %v893_v6  ;;  %217 = vperm.xlu0 %764, %v119_v5   ;;  %v1041_v8 = vrot.slane %v115_v48, %v60_v21  ;;  %v1044_v12 = vrot.slane %v112_v46, %v976_v14  ;;  %v1047_v13 = vrot.slane %v113_v47, %v976_v14 }
  0x23   :  { %273 = vperm.xlu1 %762, %v117_v3   ;;  %v1050_v15 = vrot.slane %v114_v49, %v976_v14  ;;  %v1053_v16 = vrot.slane %v115_v48, %v976_v14 }
  0x26   :  { %765 = vset.pattern.permute.xlu0 %v893_v6 }
  0x27   :  { %763 = vset.pattern.permute.xlu1 %v891_v0  ;;  %269 = vperm.xlu0 %765, %v116_v2   ;;  %v120_v0 = vld [vmem:[#allocation2] sm:$0xff] }
  0x28   :  { %213 = vperm.xlu1 %763, %v118_v4  }
  0x2b   :  { %277 = vperm.xlu0 %765, %v118_v4  }
  0x2c   :  { %766 = vset.pattern.permute.xlu1 %v894_v7 }
  0x2d   :  { %333 = vperm.xlu1 %766, %v116_v2   ;;  %v123_v2 = vld [vmem:[#allocation2 + $0x18] sm:$0xff] }
  0x2f   :  { %769 = vset.pattern.permute.xlu0 %v894_v7 }
  0x30   :  { %345 = vperm.xlu0 %769, %v119_v5  }
  0x31   :  { %337 = vperm.xlu1 %766, %v117_v3  }
  0x34   :  { %771 = vset.pattern.permute.xlu0 %v892_v1 }
  0x35   :  { %767 = vset.pattern.permute.xlu1 %v893_v6  ;;  %v1037_v6 = vrot.slane %v113_v47, %v60_v21 }
  0x36   :  { %281 = vperm.xlu1 %767, %v119_v5  }
  0x3a   :  { %768 = vset.pattern.permute.xlu1 %v894_v7  ;;  %v1039_v7 = vrot.slane %v114_v49, %v60_v21  ;;  %v128_v49 = vld [vmem:[#allocation2 + $0x40] sm:$0xff] }
  0x3b   :  { %341 = vperm.xlu1 %768, %v118_v4   ;;  %v1034_v4 = vrot.slane %v112_v46, %v60_v21 }
  0x3f   :  { %770 = vset.pattern.permute.xlu1 %v892_v1  ;;  %v121_v1 = vld [vmem:[#allocation2 + $0x8] sm:$0xff] }
  0x40   :  { %496 = vperm.xlu1 %770, %v493_v9   ;;  %v122_v9 = vld [vmem:[#allocation2 + $0x10] sm:$0xff] }
  0x94   :  { %v206_v32 = vpop.permute.xlu1 %205  ;;  %v139_v35 = vpop.permute.xlu0 %138 }
  0x95   :  { %v172_v57 = vmul.f32 %v159_v52, %v139_v35  ;;  %v173_v58 = vmul.f32 %v163_v53, %v139_v35  ;;  %v175_v59 = vmul.f32 %v1017_v54, %v139_v35  ;;  %v174_v5 = vmul.f32 %v1019_v55, %v139_v35 }
  0x96   :  { %v236_v17 = vmul.f32 %v1021_v56, %v206_v32  ;;  %v237_v21 = vmul.f32 %v1026_v61, %v206_v32  ;;  %v238_v24 = vmul.f32 %v1028_v62, %v206_v32  ;;  %v239_v25 = vmul.f32 %v1030_v63, %v206_v32 }
  0x97   :  { %v188_v18 = vadd.f32 %v172_v57, %v120_v0  ;;  %v189_v22 = vadd.f32 %v173_v58, %v121_v1  ;;  %v191_v23 = vadd.f32 %v175_v59, %v123_v2  ;;  %v190_v28 = vadd.f32 %v174_v5, %v122_v9  ;;  %v129_v0 = vld [vmem:[#allocation2 + $0x48] sm:$0xff]  ;;  %v130_v1 = vld [vmem:[#allocation2 + $0x50] sm:$0xff]  ;;  %v131_v2 = vld [vmem:[#allocation2 + $0x58] sm:$0xff] }
  0x98   :  { %v210_v44 = vpop.permute.xlu1 %209  ;;  %v144_v45 = vpop.permute.xlu0 %143 }
  0x99   :  { %v177_v26 = vmul.f32 %v163_v53, %v144_v45  ;;  %v240_v29 = vmul.f32 %v1021_v56, %v210_v44  ;;  %v241_v14 = vmul.f32 %v1026_v61, %v210_v44  ;;  %v1064_v33 = vmul.f32 %v1028_v62, %v210_v44 }
  0x9a   :  { %v243_v35 = vmul.f32 %v1030_v63, %v210_v44  ;;  %v176_v36 = vmul.f32 %v159_v52, %v144_v45  ;;  %v178_v37 = vmul.f32 %v1019_v55, %v144_v45  ;;  %v179_v38 = vmul.f32 %v1017_v54, %v144_v45 }
  0x9b   :  { %v253_v43 = vadd.f32 %v237_v21, %v189_v22  ;;  %v1071_v46 = vadd.f32 %v239_v25, %v191_v23  ;;  %v1073_v47 = vadd.f32 %v236_v17, %v188_v18  ;;  %v193_v48 = vadd.f32 %v177_v26, %v125_v34  ;;  %v132_v21 = vld [vmem:[#allocation2 + $0x60] sm:$0xff]  ;;  %v133_v25 = vld [vmem:[#allocation2 + $0x68] sm:$0xff] }
  0x9c   :  { %v149_v51 = vpop.permute.xlu0 %148  ;;  %v1083_v17 = vadd.f32 %v238_v24, %v190_v28  ;;  %v192_v18 = vadd.f32 %v176_v36, %v124_v39  ;;  %v194_v22 = vadd.f32 %v178_v37, %v126_v40  ;;  %v195_v23 = vadd.f32 %v179_v38, %v127_v41  ;;  %v134_v24 = vld [vmem:[#allocation2 + $0x70] sm:$0xff]  ;;  %v135_v39 = vld [vmem:[#allocation2 + $0x78] sm:$0xff] }
  0x9d   :  { %v1015_v50 = vpop.permute.xlu1 %153  ;;  %v180_v42 = vmul.f32 %v159_v52, %v149_v51  ;;  %v181_v57 = vmul.f32 %v163_v53, %v149_v51  ;;  %v182_v44 = vmul.f32 %v1019_v55, %v149_v51  ;;  %v183_v58 = vmul.f32 %v1017_v54, %v149_v51 }
  0x9e   :  { %v184_v45 = vmul.f32 %v159_v52, %v1015_v50  ;;  %v185_v59 = vmul.f32 %v163_v53, %v1015_v50  ;;  %v186_v52 = vmul.f32 %v1019_v55, %v1015_v50  ;;  %v187_v53 = vmul.f32 %v1017_v54, %v1015_v50 }
  0x9f   :  { %v196_v26 = vadd.f32 %v180_v42, %v128_v49  ;;  %v197_v28 = vadd.f32 %v181_v57, %v129_v0  ;;  %v1093_v36 = vadd.f32 %v182_v44, %v130_v1  ;;  %v199_v37 = vadd.f32 %v183_v58, %v131_v2 }
  0xa0   :  { %v257_v38 = vadd.f32 %v241_v14, %v193_v48  ;;  %v200_v40 = vadd.f32 %v184_v45, %v132_v21  ;;  %v201_v41 = vadd.f32 %v185_v59, %v133_v25  ;;  %v202_v49 = vadd.f32 %v186_v52, %v134_v24 }
  0xa1   :  { %v1032_v3 = vpop.permute.xlu0 %217  ;;  %v259_v59 = vadd.f32 %v243_v35, %v195_v23  ;;  %v256_v0 = vadd.f32 %v240_v29, %v192_v18 }
  0xa2   :  { %v1024_v60 = vpop.permute.xlu1 %273  ;;  %v248_v10 = vmul.f32 %v1021_v56, %v1032_v3  ;;  %v249_v54 = vmul.f32 %v1026_v61, %v1032_v3  ;;  %v250_v42 = vmul.f32 %v1028_v62, %v1032_v3  ;;  %v251_v57 = vmul.f32 %v1030_v63, %v1032_v3 }
  0xa3   :  { %v305_v51 = vmul.f32 %v1037_v6, %v1024_v60  ;;  %v307_v44 = vmul.f32 %v1041_v8, %v1024_v60  ;;  %v304_v1 = vmul.f32 %v1034_v4, %v1024_v60  ;;  %v1121_v3 = vadd.f32 %v1064_v33, %v194_v22 }
  0xa4   :  { %v264_v25 = vadd.f32 %v248_v10, %v200_v40  ;;  %v266_v52 = vadd.f32 %v250_v42, %v202_v49 }
  0xa5   :  { %v321_v48 = vadd.f32 %v305_v51, %v257_v38  ;;  %v265_v51 = vadd.f32 %v249_v54, %v201_v41 }
  0xa6   :  { %v1069_v32 = vpop.permute.xlu0 %269 }
  0xa7   :  { %v1059_v27 = vpop.permute.xlu1 %213  ;;  %v301_v5 = vmul.f32 %v1037_v6, %v1069_v32  ;;  %v302_v54 = vmul.f32 %v1039_v7, %v1069_v32 }
  0xa8   :  { %v245_v2 = vmul.f32 %v1026_v61, %v1059_v27  ;;  %v323_v61 = vadd.f32 %v307_v44, %v259_v59  ;;  %v244_v33 = vmul.f32 %v1021_v56, %v1059_v27  ;;  %v300_v56 = vmul.f32 %v1034_v4, %v1069_v32 }
  0xa9   :  { %v317_v50 = vadd.f32 %v301_v5, %v253_v43  ;;  %v203_v43 = vadd.f32 %v187_v53, %v135_v39  ;;  %v1125_v53 = vmul.f32 %v1039_v7, %v1024_v60  ;;  %v247_v60 = vmul.f32 %v1030_v63, %v1059_v27 }
  0xaa   :  { %v1097_v55 = vpop.permute.xlu0 %277  ;;  %v261_v24 = vadd.f32 %v245_v2, %v197_v28  ;;  %v1136_v39 = vadd.f32 %v304_v1, %v256_v0 }
  0xab   :  { %v267_v35 = vadd.f32 %v251_v57, %v203_v43  ;;  %v309_v40 = vmul.f32 %v1037_v6, %v1097_v55  ;;  %v263_v57 = vadd.f32 %v247_v60, %v199_v37  ;;  %v308_v44 = vmul.f32 %v1034_v4, %v1097_v55 }
  0xac   :  { %v1081_v9 = vpop.permute.xlu1 %333 }
  0xad   :  { %v365_v34 = vmul.f32 %v1047_v13, %v1081_v9  ;;  %v367_v41 = vmul.f32 %v1053_v16, %v1081_v9  ;;  %v325_v59 = vadd.f32 %v309_v40, %v261_v24 }
  0xaf   :  { %v1111_v58 = vadd.f32 %v365_v34, %v317_v50  ;;  %v346_v5 = vpop.permute.xlu0 %345  ;;  %v303_v34 = vmul.f32 %v1041_v8, %v1069_v32  ;;  %v311_v32 = vmul.f32 %v1041_v8, %v1097_v55 }
  0xb0   :  { %v1099_v11 = vpop.permute.xlu1 %337  ;;  %v376_v10 = vmul.f32 %v1044_v12, %v346_v5  ;;  %v377_v1 = vmul.f32 %v1047_v13, %v346_v5 }
  0xb1   :  { %v369_v14 = vmul.f32 %v1047_v13, %v1099_v11  ;;  %v397_v21 = vsub.f32 0.0, %v1111_v58  ;;  %v371_v63 = vmul.f32 %v1053_v16, %v1099_v11 }
  0xb3   :  { %v1113_v45 = vadd.f32 %v369_v14, %v321_v48  ;;  %v414_v22 = vmul.f32 1.442695, %v397_v21  ;;  %v246_v14 = vmul.f32 %v1028_v62, %v1059_v27  ;;  %v260_v48 = vadd.f32 %v244_v33, %v196_v26 }
  0xb4   :  { %v364_v26 = vmul.f32 %v1044_v12, %v1081_v9  ;;  %v316_v21 = vadd.f32 %v300_v56, %v1073_v47  ;;  %v379_v33 = vmul.f32 %v1053_v16, %v346_v5 }
  0xb5   :  { %v282_v29 = vpop.permute.xlu1 %281  ;;  %v401_v23 = vsub.f32 0.0, %v1113_v45  ;;  %776 = vpow2.f32 %v414_v22  ;;  %v378_v22 = vmul.f32 %v1050_v15, %v346_v5 }
  0xb6   :  { %v312_v18 = vmul.f32 %v1034_v4, %v282_v29  ;;  %v313_v50 = vmul.f32 %v1037_v6, %v282_v29  ;;  %v319_v6 = vadd.f32 %v303_v34, %v1071_v46  ;;  %v315_v62 = vmul.f32 %v1041_v8, %v282_v29 }
  0xb7   :  { %v422_v42 = vmul.f32 1.442695, %v401_v23  ;;  %v1164_v46 = vadd.f32 %v371_v63, %v323_v61  ;;  %v262_v4 = vadd.f32 %v246_v14, %v1093_v36  ;;  %v327_v23 = vadd.f32 %v311_v32, %v263_v57 }
  0xb8   :  { %v328_v38 = vadd.f32 %v312_v18, %v264_v25  ;;  %v329_v0 = vadd.f32 %v313_v50, %v265_v51  ;;  %v1160_v2 = vadd.f32 %v367_v41, %v319_v6  ;;  %v324_v25 = vadd.f32 %v308_v44, %v260_v48 }
  0xb9   :  { %778 = vpow2.f32 %v422_v42  ;;  %v310_v18 = vmul.f32 %v1039_v7, %v1097_v55  ;;  %v331_v34 = vadd.f32 %v315_v62, %v267_v35  ;;  %v403_v47 = vsub.f32 0.0, %v1164_v46 }
  0xba   :  { %v342_v28 = vpop.permute.xlu1 %341  ;;  %v1151_v49 = vadd.f32 %v376_v10, %v328_v38  ;;  %v1177_v61 = vadd.f32 %v377_v1, %v329_v0  ;;  %v399_v36 = vsub.f32 0.0, %v1160_v2  ;;  %v1186_v38 = vadd.f32 %v364_v26, %v316_v21 }
  0xbb   :  { %v373_v43 = vmul.f32 %v1047_v13, %v342_v28  ;;  %v372_v27 = vmul.f32 %v1044_v12, %v342_v28  ;;  %v314_v13 = vmul.f32 %v1039_v7, %v282_v29  ;;  %v375_v51 = vmul.f32 %v1053_v16, %v342_v28 }
  0xbc   :  { %v408_v37 = vsub.f32 0.0, %v1151_v49  ;;  %v374_v24 = vmul.f32 %v1050_v15, %v342_v28  ;;  %v326_v41 = vadd.f32 %v310_v18, %v262_v4  ;;  %v368_v16 = vmul.f32 %v1044_v12, %v1099_v11 }
  0xbd   :  { %v1173_v8 = vadd.f32 %v373_v43, %v325_v59  ;;  %v1181_v10 = vadd.f32 %v372_v27, %v324_v25  ;;  %v330_v7 = vadd.f32 %v314_v13, %v266_v52  ;;  %v1188_v55 = vadd.f32 %v375_v51, %v327_v23 }
  0xbe   :  { %v436_v60 = vmul.f32 1.442695, %v408_v37  ;;  %v409_v50 = vsub.f32 0.0, %v1177_v61  ;;  %v418_v56 = vmul.f32 1.442695, %v399_v36  ;;  %v1194_v63 = vadd.f32 %v379_v33, %v331_v34 }
  0xbf   :  { %v777_v29 = vpop.eup %776  ;;  %v405_v40 = vsub.f32 0.0, %v1173_v8  ;;  %v404_v5 = vsub.f32 0.0, %v1181_v10  ;;  %v426_v28 = vmul.f32 1.442695, %v403_v47  ;;  %v318_v42 = vadd.f32 %v302_v54, %v1083_v17 }
  0xc0   :  { %v445_v35 = vadd.f32 1.0, %v777_v29  ;;  %v366_v52 = vmul.f32 %v1050_v15, %v1081_v9  ;;  %780 = vpow2.f32 %v436_v60  ;;  %v1200_v14 = vadd.f32 %v374_v24, %v326_v41 }
  0xc1   :  { %v396_v48 = vsub.f32 0.0, %v1186_v38  ;;  %v1203_v12 = vadd.f32 %v378_v22, %v330_v7  ;;  %v407_v57 = vsub.f32 0.0, %v1188_v55  ;;  %v430_v44 = vmul.f32 1.442695, %v405_v40 }
  0xc2   :  { %782 = vrcp.f32 %v445_v35  ;;  %v438_v32 = vmul.f32 1.442695, %v409_v50  ;;  %v1207_v17 = vadd.f32 %v368_v16, %v1136_v39  ;;  %v370_v9 = vmul.f32 %v1050_v15, %v1099_v11 }
  0xc3   :  { %v779_v6 = vpop.eup %778  ;;  %784 = vpow2.f32 %v418_v56  ;;  %v411_v54 = vsub.f32 0.0, %v1194_v63  ;;  %v428_v59 = vmul.f32 1.442695, %v404_v5  ;;  %v406_v0 = vsub.f32 0.0, %v1200_v14 }
  0xc4   :  { %v449_v43 = vadd.f32 1.0, %v779_v6  ;;  %786 = vpow2.f32 %v426_v28  ;;  %v412_v1 = vmul.f32 1.442695, %v396_v48  ;;  %v322_v62 = vadd.f32 %v1125_v53, %v1121_v3 }
  0xc5   :  { %v410_v27 = vsub.f32 0.0, %v1203_v12  ;;  %v434_v4 = vmul.f32 1.442695, %v407_v57  ;;  %v1216_v39 = vadd.f32 %v366_v52, %v318_v42  ;;  %v400_v11 = vsub.f32 0.0, %v1207_v17 }
  0xc6   :  { %788 = vrcp.f32 %v449_v43  ;;  %v442_v15 = vmul.f32 1.442695, %v411_v54  ;;  %v1219_v26 = vadd.f32 %v370_v9, %v322_v62  ;;  %v432_v37 = vmul.f32 1.442695, %v406_v0 }
  0xc7   :  { %790 = vpow2.f32 %v430_v44  ;;  %v440_v21 = vmul.f32 1.442695, %v410_v27  ;;  %v398_v25 = vsub.f32 0.0, %v1216_v39  ;;  %v420_v53 = vmul.f32 1.442695, %v400_v11 }
  0xc8   :  { %792 = vpow2.f32 %v438_v32  ;;  %v402_v51 = vsub.f32 0.0, %v1219_v26 }
  0xc9   :  { %794 = vpow2.f32 %v428_v59  ;;  %v416_v34 = vmul.f32 1.442695, %v398_v25 }
  0xca   :  { %796 = vpow2.f32 %v412_v1  ;;  %v781_v3 = vpop.eup %780  ;;  %v424_v24 = vmul.f32 1.442695, %v402_v51 }
  0xcb   :  { %798 = vpow2.f32 %v434_v4  ;;  %v456_v35 = vadd.f32 1.0, %v781_v3 }
  0xcc   :  { %v783_v13 = vpop.eup %782  ;;  %800 = vpow2.f32 %v442_v15 }
  0xcd   :  { %v785_v18 = vpop.eup %784  ;;  %802 = vpow2.f32 %v432_v37  ;;  %v477_v22 = vmul.f32 %v783_v13, %v1111_v58 }
  0xce   :  { %v787_v23 = vpop.eup %786  ;;  %804 = vpow2.f32 %v440_v21  ;;  %v447_v36 = vadd.f32 1.0, %v785_v18 }
  0xcf   :  { %v451_v47 = vadd.f32 1.0, %v787_v23  ;;  %806 = vpow2.f32 %v420_v53 }
  0xd0   :  { %v789_v33 = vpop.eup %788  ;;  %808 = vrcp.f32 %v447_v36 }
  0xd1   :  { %v791_v29 = vpop.eup %790  ;;  %v481_v60 = vmul.f32 %v789_v33, %v1113_v45  ;;  %810 = vrcp.f32 %v451_v47 }
  0xd2   :  { %v793_v7 = vpop.eup %792  ;;  %812 = vpow2.f32 %v416_v34  ;;  %v453_v50 = vadd.f32 1.0, %v791_v29 }
  0xd3   :  { %v795_v40 = vpop.eup %794  ;;  %v733_v41 = vpack.c.bf16 %v481_v60, %v477_v22  ;;  %v457_v5 = vadd.f32 1.0, %v793_v7  ;;  %814 = vpow2.f32 %v424_v24 }
  0xd4   :  { %v797_v16 = vpop.eup %796  ;;  %v452_v28 = vadd.f32 1.0, %v795_v40  ;;  %816 = vrcp.f32 %v456_v35 }
  0xd5   :  { %v799_v56 = vpop.eup %798  ;;  %734 = vmatprep.subr.bf16.mxu0 %v733_v41  ;;  %v444_v58 = vadd.f32 1.0, %v797_v16  ;;  %818 = vrcp.f32 %v453_v50 }
  0xd6   :  { %v801_v42 = vpop.eup %800  ;;  %v455_v45 = vadd.f32 1.0, %v799_v56  ;;  %820 = vrcp.f32 %v457_v5 }
  0xd7   :  { %v803_v52 = vpop.eup %802  ;;  %v459_v57 = vadd.f32 1.0, %v801_v42  ;;  %822 = vrcp.f32 %v452_v28 }
  0xd8   :  { %v805_v48 = vpop.eup %804  ;;  %v454_v32 = vadd.f32 1.0, %v803_v52  ;;  %824 = vrcp.f32 %v444_v58 }
  0xd9   :  { %v807_v6 = vpop.eup %806  ;;  %826 = vrcp.f32 %v455_v45  ;;  %v458_v59 = vadd.f32 1.0, %v805_v48 }
  0xda   :  { %v809_v44 = vpop.eup %808  ;;  %v448_v43 = vadd.f32 1.0, %v807_v6 }
  0xdb   :  { %v811_v9 = vpop.eup %810  ;;  %v479_v0 = vmul.f32 %v809_v44, %v1160_v2 }
  0xdc   :  { %v813_v54 = vpop.eup %812  ;;  %v483_v1 = vmul.f32 %v811_v9, %v1164_v46  ;;  %828 = vrcp.f32 %v448_v43 }
  0xdd   :  { %830 = vrcp.f32 %v459_v57  ;;  %v446_v62 = vadd.f32 1.0, %v813_v54  ;;  %v815_v27 = vpop.eup %814 }
  0xde   :  { %832 = vrcp.f32 %v454_v32  ;;  %v741_v4 = vpack.c.bf16 %v483_v1, %v479_v0  ;;  %v450_v11 = vadd.f32 1.0, %v815_v27  ;;  %v817_v15 = vpop.eup %816 }
  0xdf   :  { %834 = vrcp.f32 %v446_v62  ;;  %v819_v37 = vpop.eup %818  ;;  %v488_v60 = vmul.f32 %v817_v15, %v1151_v49  ;;  %v492_v49 = vld [vmem:[%s1270_s6] sm:$0xf]  ;;  %s862_s6 = scalar_lea.vmem %s723_s3, 64 }
  0xe0   :  { %836 = vrcp.f32 %v458_v59  ;;  %742 = vmatprep.subr.bf16.mxu1 %v741_v4  ;;  %v821_v21 = vpop.eup %820  ;;  %v485_v2 = vmul.f32 %v819_v37, %v1173_v8  ;;  %p863_p8 = scmp.ne.s32.totalorder %s723_s3, %s862_s6  ;;  %p868_p10 = scmp.lt.s32.totalorder %s862_s6, %s862_s6 }
  0xe1   :  { %838 = vrcp.f32 %v450_v11  ;;  %v823_v25 = vpop.eup %822  ;;  %v489_v13 = vmul.f32 %v821_v21, %v1177_v61  ;;  %v896_v11 = vmov 1966171168  }
  0xe2   :  { %v825_v3 = vpop.eup %824  ;;  %v484_v36 = vmul.f32 %v823_v25, %v1181_v10  ;;  %p869_p11 = por %p868_p10, %p867_p9 }
  0xe3   :  { %v827_v53 = vpop.eup %826  ;;  %v476_v18 = vmul.f32 %v825_v3, %v1186_v38  ;;  %v737_v33 = vpack.c.bf16 %v489_v13, %v485_v2 }
  0xe4   :  { %v487_v22 = vmul.f32 %v827_v53, %v1188_v55  ;;  %v739_v7 = vpack.c.bf16 %v488_v60, %v484_v36  ;;  %p870_p12 = pnand %p869_p11, %p863_p8 }
  0xe6   :  { %v829_v46 = vpop.eup %828 }
  0xe7   :  { %v831_v51 = vpop.eup %830  ;;  %v480_v23 = vmul.f32 %v829_v46, %v1207_v17 }
  0xe8   :  { %v833_v34 = vpop.eup %832  ;;  %v491_v61 = vmul.f32 %v831_v51, %v1194_v63  ;;  %v497_v63 = vpop.permute.xlu1 %496 }
  0xe9   :  { %v835_v47 = vpop.eup %834  ;;  %v735_v29 = vpack.c.bf16 %v480_v23, %v476_v18  ;;  %v486_v10 = vmul.f32 %v833_v34, %v1200_v14 }
  0xea   :  { %v837_v8 = vpop.eup %836  ;;  %v478_v38 = vmul.f32 %v835_v47, %v1216_v39  ;;  %v745_v40 = vpack.c.bf16 %v491_v61, %v487_v22 }
  0xeb   :  { %v839_v24 = vpop.eup %838  ;;  %736 = vmatpush1.bf16.msra.mxu0 %v735_v29  ;;  %v490_v41 = vmul.f32 %v837_v8, %v1203_v12 }
  0xec   :  { %v482_v17 = vmul.f32 %v839_v24, %v1219_v26  ;;  %738 = vmatprep.subr.bf16.mxu0 %v737_v33  ;;  %v1276_v33 = vld [vmem:[#allocation8_spill] sm:$0xff] }
  0xed   :  { %v747_v55 = vpack.c.bf16 %v490_v41, %v486_v10 }
  0xee   :  { %v743_v35 = vpack.c.bf16 %v482_v17, %v478_v38 }
  0xef   :  { %740 = vmatpush1.bf16.msra.mxu0 %v739_v7  ;;  %v1277_v7 = vlaneseq }
  0xf0   :  { %744 = vmatpush1.bf16.msra.mxu1 %v743_v35 }
  0xf1   :  { %746 = vmatprep.subr.bf16.mxu1 %v745_v40  ;;  %vm713_vm2 = vcmp.lt.s32.totalorder %v1277_v7, 512 }
  0xf2   :  { %731 = vmatmul.mubr.msk.f32.vlgmr.msra.gmra.mrb[0].mxu0 %vm499_vm0, %v492_v49 }
  0xf4   :  { %748 = vmatpush1.bf16.msra.mxu1 %v747_v55 }
  0xf7   :  { %732 = vmatmul.mubr.msk.f32.vlgmr.msra.gmra.mrb[0].mxu1 %vm499_vm0, %v492_v49 }
 0x1c5   :  { %v569_v39 = vpop.f32.mrb[0].mxu0 }
 0x1c6   :  { %v570_v26 = vadd.f32 %v569_v39, %v497_v63  ;;  %v571_v14 = vpop.f32.mrb[1].mxu0 }
 0x1c7   :  { %v572_v16 = vadd.f32 %v571_v14, %v497_v63 }
 0x1c8   :  { %v645_v50 = vsub.f32 %v570_v26, %v993_v19 }
 0x1c9   :  { %v646_v12 = vsub.f32 %v572_v16, %v1005_v30 }
 0x1ca   :  { %v649_v56 = vmul.f32 %v645_v50, %v645_v50  ;;  %v640_v5 = vpop.f32.mrb[0].mxu1 }
 0x1cb   :  { %v641_v28 = vadd.f32 %v640_v5, %v497_v63  ;;  %v650_v42 = vmul.f32 %v646_v12, %v646_v12  ;;  %v642_v58 = vpop.f32.mrb[1].mxu1 }
 0x1cc   :  { %v654_v52 = vsel %vm653_vm1, %v649_v56, 0.0  ;;  %v643_v45 = vadd.f32 %v642_v58, %v497_v63 }
 0x1cd   :  { %v655_v48 = vrot.slane %v654_v52, 4  ;;  %v647_v6 = vsub.f32 %v641_v28, %v998_v20  ;;  %v661_v57 = vsel %vm653_vm1, %v650_v42, 0.0  ;;  %v689_v20 = vunpack.c.l.s4 %v896_v11 }
 0x1ce   :  { %v662_v44 = vrot.slane %v661_v57, 4  ;;  %v648_v32 = vsub.f32 %v643_v45, %v1009_v31 }
 0x1cf   :  { %v656_v19 = vadd.f32 %v655_v48, %v654_v52  ;;  %v651_v43 = vmul.f32 %v647_v6, %v647_v6  ;;  %v690_v46 = vunpack.c.0.s8 %v689_v20 }
 0x1d0   :  { %v663_v9 = vadd.f32 %v662_v44, %v661_v57  ;;  %v652_v30 = vmul.f32 %v648_v32, %v648_v32 }
 0x1d1   :  { %v657_v54 = vrot.slane %v656_v19, 2  ;;  %v668_v59 = vsel %vm653_vm1, %v651_v43, 0.0  ;;  %v693_v47 = vsub.s32 %v690_v46, %v1276_v33 }
 0x1d2   :  { %v669_v0 = vrot.slane %v668_v59, 4  ;;  %v664_v1 = vrot.slane %v663_v9, 2  ;;  %v675_v62 = vsel %vm653_vm1, %v652_v30, 0.0 }
 0x1d3   :  { %v658_v27 = vadd.f32 %v657_v54, %v656_v19  ;;  %v676_v4 = vrot.slane %v675_v62, 4 }
 0x1d4   :  { %v670_v15 = vadd.f32 %v669_v0, %v668_v59  ;;  %v665_v37 = vadd.f32 %v664_v1, %v663_v9 }
 0x1d5   :  { %v659_v21 = vrot.slane %v658_v27, 1  ;;  %v677_v25 = vadd.f32 %v676_v4, %v675_v62 }
 0x1d6   :  { %v671_v31 = vrot.slane %v670_v15, 2  ;;  %v666_v3 = vrot.slane %v665_v37, 1 }
 0x1d7   :  { %v660_v2 = vadd.f32 %v659_v21, %v658_v27  ;;  %v678_v53 = vrot.slane %v677_v25, 2 }
 0x1d8   :  { %v672_v13 = vadd.f32 %v671_v31, %v670_v15  ;;  %v667_v51 = vadd.f32 %v666_v3, %v665_v37 }
 0x1d9   :  { %v679_v18 = vadd.f32 %v678_v53, %v677_v25 }
 0x1da   :  { %v673_v23 = vrot.slane %v672_v13, 1  ;;  %v686_v36 = vcombine.low %v660_v2, %v667_v51 }
 0x1db   :  { %v680_v34 = vrot.slane %v679_v18, 1 }
 0x1dc   :  { %v674_v29 = vadd.f32 %v673_v23, %v672_v13  ;;  %v694_v8 = vrot.slane %v686_v36, %v693_v47 }
 0x1dd   :  { %v681_v22 = vadd.f32 %v680_v34, %v679_v18 }
 0x1df   :  { %v687_v60 = vcombine.low %v674_v29, %v681_v22 }
 0x1e1   :  { %v701_v24 = vrot.slane %v687_v60, %v693_v47 }
 0x1e3   :  { %v702_v61 = vcombine.low %v694_v8, %v701_v24 }
 0x1e5   :  { %v709_v38 = vrot.slane %v702_v61, %v693_v47 }
 0x1e7   :  { %715 = vst.msk [vmem:[#allocation5] sm:$0xf] %vm713_vm2, %v709_v38 }
 0x1e8   :  { %873 = shalt.err (!%p870_p12)
}
 0x1e9   :  { %s874_s18 = scalar_lea.hbm %s1272_s8, 64 }
 0x1ea   :  { %p875_p13 = scmp.ne.s32.totalorder %s1272_s8, %s874_s18  ;;  %p878_p0 = scmp.lt.u32.totalorder %s874_s18, %s1272_s8 }
 0x1ec   :  { %p880_p1 = pnand %p878_p0, %p875_p13 }
 0x1ee   :  { %883 = shalt.err (!%p880_p1)
}
 0x1ef   :  { %725 = dma.vmem_to_hbm [thread:$0]  %s723_s3, 64, %s1272_s8, [#allocation4]  }
 0x1f0   :  { %886 = dma.done.wait [#allocation4], 64  }
 0x1f1   :  { %887 = vsyncadd [#allocation4], 4294967232 }
 0x1f2   :  { %729 = vsyncpa [#allocation3], 1 }
 0x1f3   :  { %730 = vsyncpa [#allocation4], 1 }

</bundles_post_ra>
